<compile_context>
chip_gen: v7x
topology: tpu7x:2x2x1
jax: 0.10.0
libtpu: 0.0.40
codegen_flags: <defaults>
</compile_context>

<pallas_src>
import jax
import jax.numpy as jnp
from jax.experimental import pallas as pl
from jax.experimental.pallas import tpu as pltpu


def _blur_kernel(x_ref, o_ref):
    # x_ref / o_ref: (C_blk, H, W) slab of collapsed (N*C, H, W) tensor.
    x = x_ref[...]
    H = x.shape[1]
    W = x.shape[2]

    # Vertical pass: t[i] = x[i-1] + 2*x[i] + x[i+1], reflect at the borders
    # (row -1 -> row 1, row H -> row H-2), built from row-offset slices only.
    up = jnp.concatenate([x[:, 1:2, :], x[:, : H - 1, :]], axis=1)
    down = jnp.concatenate([x[:, 1:, :], x[:, H - 2 : H - 1, :]], axis=1)
    t = up + 2.0 * x + down

    # Horizontal pass: out[:, j] = t[:, j-1] + 2*t[:, j] + t[:, j+1], reflect
    # at the borders (col -1 -> col 1, col W -> col W-2).
    left = jnp.concatenate([t[:, :, 1:2], t[:, :, : W - 1]], axis=2)
    right = jnp.concatenate([t[:, :, 1:], t[:, :, W - 2 : W - 1]], axis=2)

    # Normalization: kernel sum = 16 (normalized=True).
    o_ref[...] = ((left + 2.0 * t + right) * (1.0 / 16.0)).astype(o_ref.dtype)


def blur(x):
    """Depthwise 3x3 binomial blur, reflect padding, same-size output (NCHW)."""
    N, C, H, W = x.shape
    if H < 2 or W < 2:
        raise ValueError("reflect padding requires H >= 2 and W >= 2")

    NC = N * C
    xr = x.reshape(NC, H, W)

    # Pick the channel-block size: largest divisor of N*C whose block stays
    # around ~1 MiB (keeps double-buffered input+output and the separable
    # temporaries comfortably inside scoped VMEM on v5e/v6e/v7x).
    itemsize = jnp.dtype(x.dtype).itemsize
    bytes_per_plane = H * W * itemsize
    target_bytes = 1 << 20
    max_cb = max(1, target_bytes // bytes_per_plane)
    c_blk = min(NC, max_cb)
    while NC % c_blk != 0:
        c_blk -= 1

    grid = (NC // c_blk,)

    out = pl.pallas_call(
        _blur_kernel,
        out_shape=jax.ShapeDtypeStruct((NC, H, W), x.dtype),
        grid=grid,
        in_specs=[pl.BlockSpec((c_blk, H, W), lambda i: (i, 0, 0))],
        out_specs=pl.BlockSpec((c_blk, H, W), lambda i: (i, 0, 0)),
        compiler_params=pltpu.CompilerParams(
            dimension_semantics=("parallel",),
        ),
        cost_estimate=pl.CostEstimate(
            flops=12 * NC * H * W,           # separable: 6 MAC/elem
            transcendentals=0,
            bytes_accessed=2 * NC * H * W * itemsize,  # one read + one write
        ),
    )(xr)

    return out.reshape(N, C, H, W)


def _reference_blur(x):
    # Pure-JAX reference: depthwise conv, reflect pad, normalized kernel.
    N, C, H, W = x.shape
    f = jnp.array([1.0, 2.0, 1.0], dtype=jnp.float32)
    w = f[None, :] * f[:, None]
    w = w / jnp.sum(w)
    xpad = jnp.pad(x, ((0, 0), (0, 0), (1, 1), (1, 1)), mode="reflect")
    wk = jnp.broadcast_to(w[None, None, :, :], (C, 1, 3, 3)).astype(jnp.float32)
    out = jax.lax.conv_general_dilated(
        xpad.astype(jnp.float32), wk,
        window_strides=(1, 1), padding="VALID",
        dimension_numbers=("NCHW", "OIHW", "NCHW"),
        feature_group_count=C,
    )
    return out.astype(x.dtype)


if __name__ == "__main__":
    key = jax.random.PRNGKey(0)
    x = jax.random.normal(key, (2, 4, 16, 16), dtype=jnp.float32)

    out = blur(x)
    jax.block_until_ready(out)

    ref = _reference_blur(x)
    assert out.shape == x.shape and out.dtype == x.dtype
    assert jnp.allclose(out, ref, atol=1e-5, rtol=1e-5)

    print("KERNEL_OK")
</pallas_src>

<mosaic_0001>
module attributes {stable_mosaic.version = 11 : i64} {
  func.func @_blur_kernel(%arg0: i32, %arg1: memref<8x16x16xf32, #tpu.memory_space<vmem>>, %arg2: memref<8x16x16xf32, #tpu.memory_space<vmem>>) attributes {dimension_semantics = [#tpu.dimension_semantics<parallel>], iteration_bounds = array<i64: 1>, scalar_prefetch = 0 : i64, scratch_operands = 0 : i64, tpu.core_type = #tpu.core_type<tc>, window_params = [{transform_indices = @transform_0, window_bounds = array<i64: 8, 16, 16>}, {transform_indices = @transform_1, window_bounds = array<i64: 8, 16, 16>}]} {
    %c0 = arith.constant 0 : index
    %c0_0 = arith.constant 0 : index
    %c0_1 = arith.constant 0 : index
    %0 = vector.load %arg1[%c0, %c0_0, %c0_1] : memref<8x16x16xf32, #tpu.memory_space<vmem>>, vector<8x16x16xf32>
    %1 = vector.extract_strided_slice %0 {offsets = [0, 1, 0], sizes = [8, 1, 16], strides = [1, 1, 1]} : vector<8x16x16xf32> to vector<8x1x16xf32>
    %2 = vector.extract_strided_slice %0 {offsets = [0, 0, 0], sizes = [8, 15, 16], strides = [1, 1, 1]} : vector<8x16x16xf32> to vector<8x15x16xf32>
    %3 = tpu.concatenate %1, %2 in 1 : vector<8x1x16xf32>, vector<8x15x16xf32> -> vector<8x16x16xf32>
    %4 = vector.extract_strided_slice %0 {offsets = [0, 1, 0], sizes = [8, 15, 16], strides = [1, 1, 1]} : vector<8x16x16xf32> to vector<8x15x16xf32>
    %5 = vector.extract_strided_slice %0 {offsets = [0, 14, 0], sizes = [8, 1, 16], strides = [1, 1, 1]} : vector<8x16x16xf32> to vector<8x1x16xf32>
    %6 = tpu.concatenate %4, %5 in 1 : vector<8x15x16xf32>, vector<8x1x16xf32> -> vector<8x16x16xf32>
    %cst = arith.constant 2.000000e+00 : f32
    %7 = vector.broadcast %cst : f32 to vector<8x16x16xf32>
    %8 = arith.mulf %7, %0 : vector<8x16x16xf32>
    %9 = arith.addf %3, %8 : vector<8x16x16xf32>
    %10 = arith.addf %9, %6 : vector<8x16x16xf32>
    %11 = vector.extract_strided_slice %10 {offsets = [0, 0, 1], sizes = [8, 16, 1], strides = [1, 1, 1]} : vector<8x16x16xf32> to vector<8x16x1xf32>
    %12 = vector.extract_strided_slice %10 {offsets = [0, 0, 0], sizes = [8, 16, 15], strides = [1, 1, 1]} : vector<8x16x16xf32> to vector<8x16x15xf32>
    %13 = tpu.concatenate %11, %12 in 2 : vector<8x16x1xf32>, vector<8x16x15xf32> -> vector<8x16x16xf32>
    %14 = vector.extract_strided_slice %10 {offsets = [0, 0, 1], sizes = [8, 16, 15], strides = [1, 1, 1]} : vector<8x16x16xf32> to vector<8x16x15xf32>
    %15 = vector.extract_strided_slice %10 {offsets = [0, 0, 14], sizes = [8, 16, 1], strides = [1, 1, 1]} : vector<8x16x16xf32> to vector<8x16x1xf32>
    %16 = tpu.concatenate %14, %15 in 2 : vector<8x16x15xf32>, vector<8x16x1xf32> -> vector<8x16x16xf32>
    %cst_2 = arith.constant 2.000000e+00 : f32
    %17 = vector.broadcast %cst_2 : f32 to vector<8x16x16xf32>
    %18 = arith.mulf %17, %10 : vector<8x16x16xf32>
    %19 = arith.addf %13, %18 : vector<8x16x16xf32>
    %20 = arith.addf %19, %16 : vector<8x16x16xf32>
    %cst_3 = arith.constant 6.250000e-02 : f32
    %21 = vector.broadcast %cst_3 : f32 to vector<8x16x16xf32>
    %22 = arith.mulf %20, %21 : vector<8x16x16xf32>
    %c0_4 = arith.constant 0 : index
    %c0_5 = arith.constant 0 : index
    %c0_6 = arith.constant 0 : index
    %23 = vector.load %arg2[%c0_4, %c0_5, %c0_6] : memref<8x16x16xf32, #tpu.memory_space<vmem>>, vector<8x16x16xf32>
    tpu.vector_store %arg2[%c0_4, %c0_5, %c0_6], %22 {strides = array<i32>} : memref<8x16x16xf32, #tpu.memory_space<vmem>>, vector<8x16x16xf32>,
    return
  }
  func.func @transform_0(%arg0: i32) -> (i32, i32, i32) {
    %c0_i32 = arith.constant 0 : i32
    %c0_i32_0 = arith.constant 0 : i32
    %c0_i32_1 = arith.constant 0 : i32
    return %arg0, %c0_i32, %c0_i32_0 : i32, i32, i32
  }
  func.func @transform_1(%arg0: i32) -> (i32, i32, i32) {
    %c0_i32 = arith.constant 0 : i32
    %c0_i32_0 = arith.constant 0 : i32
    %c0_i32_1 = arith.constant 0 : i32
    return %arg0, %c0_i32, %c0_i32_0 : i32, i32, i32
  }
}

</mosaic_0001>

<bundles_post_ra>
// kernel: tpu_custom_call.1
= control target key start
LH: loop header
LB: loop body
LE: loop exit
PB: predicated region body
PF: predicated region fallthrough
CT: control target
= control target key end

     0   :  { %6 = vsyncpa [#allocation3], 0  ;;  %s777_s0 = inlined_call_operand.hbm [shape: f32[8,16,16], index: 0, kind: input, shape index: {}]   ;;  %s778_s1 = inlined_call_operand.hbm [shape: f32[8,16,16], index: 1, kind: output, shape index: {}]  }
   0x1   :  { %7 = vsyncpa [#allocation4], 0  ;;  %s515_s6 = smov [#allocation2]   ;;  %s467_s10 = scalar_lea.hbm %s777_s0, 2048 }
   0x2   :  { %s13_s7 = sshll.u32 %s515_s6, 4  ;;  %p468_p0 = scmp.ne.s32.totalorder %s777_s0, %s467_s10  ;;  %s14_s7 = int_to_ptr.vmem [resolvable:$true] %s13_s7 }
   0x3   :  { %p471_p1 = scmp.lt.u32.totalorder %s467_s10, %s777_s0 }
   0x5   :  { %p473_p2 = pnand %p471_p1, %p468_p0 }
   0x7   :  { %476 = shalt.err (!%p473_p2)
}
   0x8   :  { %s477_s15 = scalar_lea.vmem %s14_s7, 2048  ;;  %p482_p4 = scmp.lt.s32.totalorder %s14_s7, %s14_s7 }
   0x9   :  { %p478_p3 = scmp.ne.s32.totalorder %s14_s7, %s477_s15  ;;  %p483_p5 = scmp.lt.s32.totalorder %s477_s15, %s477_s15 }
   0xb   :  { %p484_p6 = por %p483_p5, %p482_p4 }
   0xd   :  { %p485_p7 = pnand %p484_p6, %p478_p3 }
   0xf   :  { %488 = shalt.err (!%p485_p7)
}
  0x10   :  { %s516_s16 = smov 128   ;;  %s517_s17 = smov 8  }
  0x11   :  { %19 = dma.hbm_to_vmem [thread:$0]  %s777_s0, 2048, %s14_s7, [#allocation3], %s516_s16, %s516_s16, %s517_s17  }
  0x12   :  { %511 = dma.done.wait [#allocation3], 2048  }
  0x13   :  { %512 = vsyncadd [#allocation3], 4294965248  ;;  %v25_v0 = vld [vmem:[#allocation2 + $0x10] sm:$0xff]  ;;  %v26_v1 = vld [vmem:[#allocation2 + $0x18] sm:$0xff]  ;;  %vm71_vm0 = vcmask 1040384   ;;  %vm120_vm1 = vcmask 1046528  }
  0x14   :  { %v23_v2 = vld [vmem:[#allocation2] sm:$0xff]  ;;  %v48_v3 = vrot.slane %v25_v0, 1  ;;  %v75_v4 = vrot.slane %v25_v0, 7  ;;  %v123_v5 = vrot.slane %v26_v1, 1  ;;  %v171_v6 = vmul.f32 2.0, %v25_v0  ;;  %v24_v7 = vld [vmem:[#allocation2 + $0x8] sm:$0xff] }
  0x15   :  { %v47_v8 = vrot.slane %v23_v2, 1  ;;  %v72_v9 = vrot.slane %v23_v2, 7  ;;  %v121_v10 = vrot.slane %v24_v7, 1  ;;  %v169_v11 = vmul.f32 2.0, %v23_v2  ;;  %v27_v20 = vld [vmem:[#allocation2 + $0x20] sm:$0xff]  ;;  %v28_v21 = vld [vmem:[#allocation2 + $0x28] sm:$0xff] }
  0x16   :  { %v113_v12 = vsel %vm71_vm0, %v48_v3, %v75_v4  ;;  %v124_v13 = vsel %vm120_vm1, %v48_v3, %v123_v5  ;;  %v76_v14 = vrot.slane %v26_v1, 7  ;;  %v172_v15 = vmul.f32 2.0, %v26_v1  ;;  %v29_v30 = vld [vmem:[#allocation2 + $0x30] sm:$0xff]  ;;  %s518_s0 = smov 127   ;;  %v30_v39 = vld [vmem:[#allocation2 + $0x38] sm:$0xff]  ;;  %v31_v44 = vld [vmem:[#allocation2 + $0x40] sm:$0xff] }
  0x17   :  { %v187_v16 = vadd.f32 %v171_v6, %v113_v12  ;;  %v112_v17 = vsel %vm71_vm0, %v47_v8, %v72_v9  ;;  %v122_v18 = vsel %vm120_vm1, %v47_v8, %v121_v10  ;;  %v73_v19 = vrot.slane %v24_v7, 7  ;;  %v32_v49 = vld [vmem:[#allocation2 + $0x48] sm:$0xff]  ;;  %v33_v62 = vld [vmem:[#allocation2 + $0x50] sm:$0xff]  ;;  %v35_v12 = vld [vmem:[#allocation2 + $0x60] sm:$0xff]  ;;  %s519_s20 = smov 1   ;;  %s520_s21 = smov [#allocation5]  }
  0x18   :  { %v185_v22 = vadd.f32 %v169_v11, %v112_v17  ;;  %v77_v23 = vsel %vm71_vm0, %v75_v4, %v76_v14  ;;  %v162_v24 = vsel %vm120_vm1, %v123_v5, %v76_v14  ;;  %v170_v25 = vmul.f32 2.0, %v24_v7  ;;  %v34_v7 = vld [vmem:[#allocation2 + $0x58] sm:$0xff]  ;;  %v36_v17 = vld [vmem:[#allocation2 + $0x68] sm:$0xff]  ;;  %s449_s22 = sshll.u32 %s520_s21, 4  ;;  %s450_s22 = int_to_ptr.vmem [resolvable:$true] %s449_s22 }
  0x19   :  { %v552_v26 = vadd.f32 %v187_v16, %v124_v13  ;;  %v188_v27 = vadd.f32 %v172_v15, %v77_v23  ;;  %v74_v28 = vsel %vm71_vm0, %v72_v9, %v73_v19  ;;  %v161_v29 = vsel %vm120_vm1, %v121_v10, %v73_v19  ;;  %s489_s23 = scalar_lea.vmem %s450_s22, 2048  ;;  %p494_p9 = scmp.lt.s32.totalorder %s450_s22, %s450_s22 }
  0x1a   :  { %v556_v31 = vadd.f32 %v185_v22, %v122_v18  ;;  %v186_v32 = vadd.f32 %v170_v25, %v74_v28  ;;  %v78_v33 = vrot.slane %v27_v20, 7  ;;  %v79_v34 = vrot.slane %v28_v21, 7  ;;  %p490_p8 = scmp.ne.s32.totalorder %s450_s22, %s489_s23  ;;  %p495_p10 = scmp.lt.s32.totalorder %s489_s23, %s489_s23 }
  0x1b   :  { %237 = vrot.lane.b32.xlu1 %v552_v26, %s518_s0  ;;  %v560_v35 = vadd.f32 %v188_v27, %v162_v24  ;;  %v125_v36 = vrot.slane %v28_v21, 1  ;;  %v174_v37 = vmul.f32 2.0, %v28_v21  ;;  %v49_v38 = vrot.slane %v27_v20, 1 }
  0x1c   :  { %233 = vrot.lane.b32.xlu0 %v556_v31, %s518_s0  ;;  %v564_v40 = vadd.f32 %v186_v32, %v161_v29  ;;  %v80_v41 = vsel %vm71_vm0, %v78_v33, %v79_v34  ;;  %v173_v42 = vmul.f32 2.0, %v27_v20  ;;  %v81_v43 = vrot.slane %v29_v30, 7  ;;  %v37_v32 = vld [vmem:[#allocation2 + $0x70] sm:$0xff]  ;;  %p496_p11 = por %p495_p10, %p494_p9 }
  0x1d   :  { %v163_v45 = vsel %vm120_vm1, %v125_v36, %v79_v34  ;;  %v190_v46 = vadd.f32 %v174_v37, %v80_v41  ;;  %v114_v47 = vsel %vm71_vm0, %v49_v38, %v78_v33  ;;  %v126_v48 = vsel %vm120_vm1, %v49_v38, %v125_v36 }
  0x1e   :  { %v189_v50 = vadd.f32 %v173_v42, %v114_v47  ;;  %v82_v51 = vrot.slane %v30_v39, 7  ;;  %v127_v52 = vrot.slane %v30_v39, 1  ;;  %v176_v53 = vmul.f32 2.0, %v30_v39  ;;  %p497_p12 = pnand %p496_p11, %p490_p8 }
  0x1f   :  { %239 = vrot.lane.b32.xlu1 %v560_v35, %s518_s0  ;;  %v572_v54 = vadd.f32 %v190_v46, %v163_v45  ;;  %v50_v55 = vrot.slane %v29_v30, 1  ;;  %v175_v56 = vmul.f32 2.0, %v29_v30  ;;  %v84_v57 = vrot.slane %v31_v44, 7 }
  0x20   :  { %235 = vrot.lane.b32.xlu0 %v564_v40, %s518_s0  ;;  %v576_v58 = vadd.f32 %v189_v50, %v126_v48  ;;  %v83_v59 = vsel %vm71_vm0, %v81_v43, %v82_v51  ;;  %v164_v60 = vsel %vm120_vm1, %v127_v52, %v82_v51  ;;  %v85_v61 = vrot.slane %v32_v49, 7 }
  0x21   :  { %v192_v63 = vadd.f32 %v176_v53, %v83_v59  ;;  %v115_v0 = vsel %vm71_vm0, %v50_v55, %v81_v43  ;;  %v128_v1 = vsel %vm120_vm1, %v50_v55, %v127_v52  ;;  %v129_v2 = vrot.slane %v32_v49, 1  ;;  %v38_v43 = vld [vmem:[#allocation2 + $0x78] sm:$0xff] }
  0x22   :  { %v191_v3 = vadd.f32 %v175_v56, %v115_v0  ;;  %v86_v4 = vsel %vm71_vm0, %v84_v57, %v85_v61  ;;  %v178_v5 = vmul.f32 2.0, %v32_v49  ;;  %v51_v6 = vrot.slane %v31_v44, 1 }
  0x23   :  { %243 = vrot.lane.b32.xlu1 %v572_v54, %s518_s0  ;;  %v585_v8 = vadd.f32 %v192_v63, %v164_v60  ;;  %v165_v9 = vsel %vm120_vm1, %v129_v2, %v85_v61  ;;  %v177_v10 = vmul.f32 2.0, %v31_v44  ;;  %v87_v11 = vrot.slane %v33_v62, 7 }
  0x24   :  { %241 = vrot.lane.b32.xlu0 %v576_v58, %s518_s0  ;;  %v590_v13 = vadd.f32 %v191_v3, %v128_v1  ;;  %v194_v14 = vadd.f32 %v178_v5, %v86_v4  ;;  %v116_v15 = vsel %vm71_vm0, %v51_v6, %v84_v57  ;;  %v130_v16 = vsel %vm120_vm1, %v51_v6, %v129_v2 }
  0x25   :  { %v193_v18 = vadd.f32 %v177_v10, %v116_v15  ;;  %v88_v19 = vrot.slane %v34_v7, 7  ;;  %v131_v20 = vrot.slane %v34_v7, 1  ;;  %v180_v21 = vmul.f32 2.0, %v34_v7 }
  0x26   :  { %v594_v22 = vadd.f32 %v194_v14, %v165_v9  ;;  %v52_v23 = vrot.slane %v33_v62, 1  ;;  %v179_v24 = vmul.f32 2.0, %v33_v62  ;;  %v90_v25 = vrot.slane %v35_v12, 7 }
  0x27   :  { %247 = vrot.lane.b32.xlu1 %v585_v8, %s518_s0  ;;  %v598_v27 = vadd.f32 %v193_v18, %v130_v16  ;;  %v89_v28 = vsel %vm71_vm0, %v87_v11, %v88_v19  ;;  %v166_v29 = vsel %vm120_vm1, %v131_v20, %v88_v19  ;;  %v91_v30 = vrot.slane %v36_v17, 7 }
  0x28   :  { %245 = vrot.lane.b32.xlu0 %v590_v13, %s518_s0  ;;  %v196_v33 = vadd.f32 %v180_v21, %v89_v28  ;;  %v117_v34 = vsel %vm71_vm0, %v52_v23, %v87_v11  ;;  %v132_v36 = vsel %vm120_vm1, %v52_v23, %v131_v20  ;;  %v133_v37 = vrot.slane %v36_v17, 1 }
  0x29   :  { %v195_v38 = vadd.f32 %v179_v24, %v117_v34  ;;  %v92_v39 = vsel %vm71_vm0, %v90_v25, %v91_v30  ;;  %v182_v41 = vmul.f32 2.0, %v36_v17  ;;  %v53_v42 = vrot.slane %v35_v12, 1 }
  0x2a   :  { %v607_v44 = vadd.f32 %v196_v33, %v166_v29  ;;  %v181_v45 = vmul.f32 2.0, %v35_v12  ;;  %v93_v46 = vrot.slane %v37_v32, 7  ;;  %v167_v48 = vsel %vm120_vm1, %v133_v37, %v91_v30 }
  0x2b   :  { %251 = vrot.lane.b32.xlu1 %v594_v22, %s518_s0  ;;  %v611_v47 = vadd.f32 %v195_v38, %v132_v36  ;;  %v198_v49 = vadd.f32 %v182_v41, %v92_v39  ;;  %v118_v50 = vsel %vm71_vm0, %v53_v42, %v90_v25  ;;  %v94_v52 = vrot.slane %v38_v43, 7 }
  0x2c   :  { %249 = vrot.lane.b32.xlu0 %v598_v27, %s518_s0  ;;  %v197_v51 = vadd.f32 %v181_v45, %v118_v50  ;;  %v135_v53 = vrot.slane %v38_v43, 1  ;;  %v184_v55 = vmul.f32 2.0, %v38_v43  ;;  %v134_v56 = vsel %vm120_vm1, %v53_v42, %v133_v37 }
  0x2d   :  { %v54_v57 = vrot.slane %v37_v32, 1  ;;  %v183_v59 = vmul.f32 2.0, %v37_v32  ;;  %v95_v60 = vsel %vm71_vm0, %v93_v46, %v94_v52  ;;  %v621_v61 = vadd.f32 %v198_v49, %v167_v48 }
  0x2e   :  { %v200_v62 = vadd.f32 %v184_v55, %v95_v60  ;;  %v626_v0 = vadd.f32 %v197_v51, %v134_v56  ;;  %v168_v1 = vsel %vm120_vm1, %v135_v53, %v94_v52  ;;  %vm329_vm2 = vcmask 7168  }
  0x2f   :  { %255 = vrot.lane.b32.xlu1 %v607_v44, %s518_s0  ;;  %v119_v63 = vsel %vm71_vm0, %v54_v57, %v93_v46  ;;  %v136_v3 = vsel %vm120_vm1, %v54_v57, %v135_v53  ;;  %v364_v25 = vmul.f32 2.0, %v564_v40  ;;  %v363_v28 = vmul.f32 2.0, %v556_v31 }
  0x30   :  { %253 = vrot.lane.b32.xlu0 %v611_v47, %s518_s0  ;;  %v199_v2 = vadd.f32 %v183_v59, %v119_v63  ;;  %v632_v4 = vadd.f32 %v200_v62, %v168_v1  ;;  %vm346_vm3 = vcmask 121856   ;;  %v366_v36 = vmul.f32 2.0, %v560_v35 }
  0x31   :  { %v365_v39 = vmul.f32 2.0, %v552_v26  ;;  %vm427_vm4 = vcmask 130048   ;;  %v370_v1 = vmul.f32 2.0, %v585_v8 }
  0x32   :  { %v636_v5 = vadd.f32 %v199_v2, %v136_v3 }
  0x33   :  { %259 = vrot.lane.b32.xlu1 %v621_v61, %s518_s0 }
  0x34   :  { %257 = vrot.lane.b32.xlu0 %v626_v0, %s518_s0 }
  0x37   :  { %263 = vrot.lane.b32.xlu1 %v632_v4, %s518_s0 }
  0x38   :  { %261 = vrot.lane.b32.xlu0 %v636_v5, %s518_s0 }
  0x3b   :  { %283 = vrot.lane.b32.xlu1 %v564_v40, %s519_s20 }
  0x3c   :  { %281 = vrot.lane.b32.xlu0 %v556_v31, %s519_s20 }
  0x3f   :  { %287 = vrot.lane.b32.xlu1 %v560_v35, %s519_s20  ;;  %v368_v35 = vmul.f32 2.0, %v572_v54 }
  0x40   :  { %285 = vrot.lane.b32.xlu0 %v552_v26, %s519_s20  ;;  %v367_v26 = vmul.f32 2.0, %v576_v58 }
  0x43   :  { %291 = vrot.lane.b32.xlu1 %v572_v54, %s519_s20 }
  0x44   :  { %289 = vrot.lane.b32.xlu0 %v576_v58, %s519_s20 }
  0x47   :  { %295 = vrot.lane.b32.xlu1 %v585_v8, %s519_s20 }
  0x48   :  { %293 = vrot.lane.b32.xlu0 %v590_v13, %s519_s20 }
  0x4b   :  { %299 = vrot.lane.b32.xlu1 %v594_v22, %s519_s20 }
  0x4c   :  { %297 = vrot.lane.b32.xlu0 %v598_v27, %s519_s20 }
  0x4f   :  { %303 = vrot.lane.b32.xlu1 %v607_v44, %s519_s20 }
  0x50   :  { %301 = vrot.lane.b32.xlu0 %v611_v47, %s519_s20 }
  0x53   :  { %307 = vrot.lane.b32.xlu1 %v621_v61, %s519_s20 }
  0x54   :  { %305 = vrot.lane.b32.xlu0 %v626_v0, %s519_s20 }
  0x57   :  { %311 = vrot.lane.b32.xlu1 %v632_v4, %s519_s20 }
  0x58   :  { %309 = vrot.lane.b32.xlu0 %v636_v5, %s519_s20 }
  0x8d   :  { %v238_v6 = vpop.permute.xlu1 %237 }
  0x8e   :  { %v234_v7 = vpop.permute.xlu0 %233 }
  0x91   :  { %v240_v9 = vpop.permute.xlu1 %239 }
  0x92   :  { %v236_v10 = vpop.permute.xlu0 %235 }
  0x95   :  { %v244_v11 = vpop.permute.xlu1 %243 }
  0x96   :  { %v242_v12 = vpop.permute.xlu0 %241 }
  0x99   :  { %v658_v14 = vpop.permute.xlu1 %247 }
  0x9a   :  { %v660_v15 = vpop.permute.xlu0 %245 }
  0x9d   :  { %v662_v16 = vpop.permute.xlu1 %251 }
  0x9e   :  { %v664_v17 = vpop.permute.xlu0 %249 }
  0xa1   :  { %v666_v18 = vpop.permute.xlu1 %255 }
  0xa2   :  { %v668_v19 = vpop.permute.xlu0 %253 }
  0xa5   :  { %v670_v20 = vpop.permute.xlu1 %259 }
  0xa6   :  { %v672_v21 = vpop.permute.xlu0 %257 }
  0xa9   :  { %v674_v23 = vpop.permute.xlu1 %263 }
  0xaa   :  { %v676_v24 = vpop.permute.xlu0 %261 }
  0xad   :  { %v284_v29 = vpop.permute.xlu1 %283 }
  0xae   :  { %v331_v30 = vsel %vm329_vm2, %v236_v10, %v284_v29  ;;  %v282_v32 = vpop.permute.xlu0 %281  ;;  %v348_v37 = vsel %vm346_vm3, %v236_v10, %v284_v29 }
  0xaf   :  { %v380_v33 = vadd.f32 %v364_v25, %v331_v30  ;;  %v330_v34 = vsel %vm329_vm2, %v234_v7, %v282_v32  ;;  %v347_v40 = vsel %vm346_vm3, %v234_v7, %v282_v32  ;;  %v369_v7 = vmul.f32 2.0, %v590_v13 }
  0xb0   :  { %v379_v38 = vadd.f32 %v363_v28, %v330_v34  ;;  %v372_v13 = vmul.f32 2.0, %v594_v22  ;;  %v371_v34 = vmul.f32 2.0, %v598_v27  ;;  %v374_v27 = vmul.f32 2.0, %v607_v44 }
  0xb1   :  { %v396_v41 = vadd.f32 %v380_v33, %v348_v37  ;;  %v288_v42 = vpop.permute.xlu1 %287 }
  0xb2   :  { %v395_v31 = vadd.f32 %v379_v38, %v347_v40  ;;  %v333_v43 = vsel %vm329_vm2, %v240_v9, %v288_v42  ;;  %v286_v45 = vpop.permute.xlu0 %285  ;;  %v350_v51 = vsel %vm346_vm3, %v240_v9, %v288_v42 }
  0xb3   :  { %v412_v46 = vmul.f32 0.0625, %v396_v41  ;;  %v382_v48 = vadd.f32 %v366_v36, %v333_v43  ;;  %v332_v49 = vsel %vm329_vm2, %v238_v6, %v286_v45  ;;  %v349_v55 = vsel %vm346_vm3, %v238_v6, %v286_v45 }
  0xb4   :  { %v411_v50 = vmul.f32 0.0625, %v395_v31  ;;  %v381_v52 = vadd.f32 %v365_v39, %v332_v49  ;;  %v373_v45 = vmul.f32 2.0, %v611_v47  ;;  %v376_v47 = vmul.f32 2.0, %v621_v61 }
  0xb5   :  { %429 = vst.msk [vmem:[#allocation5 + $0x8] sm:$0xff] %vm427_vm4, %v412_v46  ;;  %v398_v53 = vadd.f32 %v382_v48, %v350_v51  ;;  %v292_v56 = vpop.permute.xlu1 %291 }
  0xb6   :  { %428 = vst.msk [vmem:[#allocation5] sm:$0xff] %vm427_vm4, %v411_v50  ;;  %v397_v57 = vadd.f32 %v381_v52, %v349_v55  ;;  %v335_v59 = vsel %vm329_vm2, %v244_v11, %v292_v56  ;;  %v290_v60 = vpop.permute.xlu0 %289  ;;  %v352_v58 = vsel %vm346_vm3, %v244_v11, %v292_v56  ;;  %v375_v55 = vmul.f32 2.0, %v626_v0 }
  0xb7   :  { %v414_v62 = vmul.f32 0.0625, %v398_v53  ;;  %v384_v54 = vadd.f32 %v368_v35, %v335_v59  ;;  %v334_v63 = vsel %vm329_vm2, %v242_v12, %v290_v60  ;;  %v351_v9 = vsel %vm346_vm3, %v242_v12, %v290_v60 }
  0xb8   :  { %v413_v2 = vmul.f32 0.0625, %v397_v57  ;;  %v383_v3 = vadd.f32 %v367_v26, %v334_v63  ;;  %v378_v0 = vmul.f32 2.0, %v632_v4 }
  0xb9   :  { %431 = vst.msk [vmem:[#allocation5 + $0x18] sm:$0xff] %vm427_vm4, %v414_v62  ;;  %v400_v6 = vadd.f32 %v384_v54, %v352_v58  ;;  %v296_v10 = vpop.permute.xlu1 %295  ;;  %v377_v58 = vmul.f32 2.0, %v636_v5 }
  0xba   :  { %430 = vst.msk [vmem:[#allocation5 + $0x10] sm:$0xff] %vm427_vm4, %v413_v2  ;;  %v399_v25 = vadd.f32 %v383_v3, %v351_v9  ;;  %v337_v28 = vsel %vm329_vm2, %v658_v14, %v296_v10  ;;  %v294_v29 = vpop.permute.xlu0 %293  ;;  %v354_v33 = vsel %vm346_vm3, %v658_v14, %v296_v10 }
  0xbb   :  { %v416_v8 = vmul.f32 0.0625, %v400_v6  ;;  %v386_v30 = vadd.f32 %v370_v1, %v337_v28  ;;  %v336_v11 = vsel %vm329_vm2, %v660_v15, %v294_v29  ;;  %v353_v37 = vsel %vm346_vm3, %v660_v15, %v294_v29 }
  0xbc   :  { %v415_v32 = vmul.f32 0.0625, %v399_v25  ;;  %v385_v12 = vadd.f32 %v369_v7, %v336_v11 }
  0xbd   :  { %433 = vst.msk [vmem:[#allocation5 + $0x28] sm:$0xff] %vm427_vm4, %v416_v8  ;;  %v402_v36 = vadd.f32 %v386_v30, %v354_v33  ;;  %v300_v38 = vpop.permute.xlu1 %299 }
  0xbe   :  { %432 = vst.msk [vmem:[#allocation5 + $0x20] sm:$0xff] %vm427_vm4, %v415_v32  ;;  %v401_v39 = vadd.f32 %v385_v12, %v353_v37  ;;  %v339_v22 = vsel %vm329_vm2, %v662_v16, %v300_v38  ;;  %v298_v41 = vpop.permute.xlu0 %297  ;;  %v356_v43 = vsel %vm346_vm3, %v662_v16, %v300_v38 }
  0xbf   :  { %v418_v40 = vmul.f32 0.0625, %v402_v36  ;;  %v388_v42 = vadd.f32 %v372_v13, %v339_v22  ;;  %v338_v14 = vsel %vm329_vm2, %v664_v17, %v298_v41  ;;  %v355_v48 = vsel %vm346_vm3, %v664_v17, %v298_v41 }
  0xc0   :  { %v417_v31 = vmul.f32 0.0625, %v401_v39  ;;  %v387_v15 = vadd.f32 %v371_v34, %v338_v14 }
  0xc1   :  { %435 = vst.msk [vmem:[#allocation5 + $0x38] sm:$0xff] %vm427_vm4, %v418_v40  ;;  %v404_v46 = vadd.f32 %v388_v42, %v356_v43  ;;  %v304_v49 = vpop.permute.xlu1 %303 }
  0xc2   :  { %434 = vst.msk [vmem:[#allocation5 + $0x30] sm:$0xff] %vm427_vm4, %v417_v31  ;;  %v403_v35 = vadd.f32 %v387_v15, %v355_v48  ;;  %v341_v44 = vsel %vm329_vm2, %v666_v18, %v304_v49  ;;  %v302_v50 = vpop.permute.xlu0 %301  ;;  %v358_v53 = vsel %vm346_vm3, %v666_v18, %v304_v49 }
  0xc3   :  { %v420_v51 = vmul.f32 0.0625, %v404_v46  ;;  %v390_v52 = vadd.f32 %v374_v27, %v341_v44  ;;  %v340_v16 = vsel %vm329_vm2, %v668_v19, %v302_v50  ;;  %v357_v57 = vsel %vm346_vm3, %v668_v19, %v302_v50 }
  0xc4   :  { %v419_v26 = vmul.f32 0.0625, %v403_v35  ;;  %v389_v17 = vadd.f32 %v373_v45, %v340_v16 }
  0xc5   :  { %437 = vst.msk [vmem:[#allocation5 + $0x48] sm:$0xff] %vm427_vm4, %v420_v51  ;;  %v406_v56 = vadd.f32 %v390_v52, %v358_v53  ;;  %v308_v59 = vpop.permute.xlu1 %307 }
  0xc6   :  { %436 = vst.msk [vmem:[#allocation5 + $0x40] sm:$0xff] %vm427_vm4, %v419_v26  ;;  %v405_v60 = vadd.f32 %v389_v17, %v357_v57  ;;  %v343_v61 = vsel %vm329_vm2, %v670_v20, %v308_v59  ;;  %v306_v62 = vpop.permute.xlu0 %305  ;;  %v360_v2 = vsel %vm346_vm3, %v670_v20, %v308_v59 }
  0xc7   :  { %v422_v54 = vmul.f32 0.0625, %v406_v56  ;;  %v392_v63 = vadd.f32 %v376_v47, %v343_v61  ;;  %v342_v18 = vsel %vm329_vm2, %v672_v21, %v306_v62  ;;  %v359_v7 = vsel %vm346_vm3, %v672_v21, %v306_v62 }
  0xc8   :  { %v421_v1 = vmul.f32 0.0625, %v405_v60  ;;  %v391_v19 = vadd.f32 %v375_v55, %v342_v18 }
  0xc9   :  { %439 = vst.msk [vmem:[#allocation5 + $0x58] sm:$0xff] %vm427_vm4, %v422_v54  ;;  %v408_v3 = vadd.f32 %v392_v63, %v360_v2  ;;  %v312_v6 = vpop.permute.xlu1 %311 }
  0xca   :  { %438 = vst.msk [vmem:[#allocation5 + $0x50] sm:$0xff] %vm427_vm4, %v421_v1  ;;  %v407_v9 = vadd.f32 %v391_v19, %v359_v7  ;;  %v345_v4 = vsel %vm329_vm2, %v674_v23, %v312_v6  ;;  %v310_v10 = vpop.permute.xlu0 %309  ;;  %v362_v29 = vsel %vm346_vm3, %v674_v23, %v312_v6 }
  0xcb   :  { %v424_v25 = vmul.f32 0.0625, %v408_v3  ;;  %v394_v28 = vadd.f32 %v378_v0, %v345_v4  ;;  %v344_v20 = vsel %vm329_vm2, %v676_v24, %v310_v10  ;;  %v361_v30 = vsel %vm346_vm3, %v676_v24, %v310_v10 }
  0xcc   :  { %v423_v5 = vmul.f32 0.0625, %v407_v9  ;;  %v393_v8 = vadd.f32 %v377_v58, %v344_v20 }
  0xcd   :  { %441 = vst.msk [vmem:[#allocation5 + $0x68] sm:$0xff] %vm427_vm4, %v424_v25  ;;  %v410_v21 = vadd.f32 %v394_v28, %v362_v29 }
  0xce   :  { %440 = vst.msk [vmem:[#allocation5 + $0x60] sm:$0xff] %vm427_vm4, %v423_v5  ;;  %v409_v11 = vadd.f32 %v393_v8, %v361_v30 }
  0xcf   :  { %v426_v13 = vmul.f32 0.0625, %v410_v21 }
  0xd0   :  { %v425_v32 = vmul.f32 0.0625, %v409_v11 }
  0xd1   :  { %443 = vst.msk [vmem:[#allocation5 + $0x78] sm:$0xff] %vm427_vm4, %v426_v13 }
  0xd2   :  { %442 = vst.msk [vmem:[#allocation5 + $0x70] sm:$0xff] %vm427_vm4, %v425_v32 }
  0xd3   :  { %500 = shalt.err (!%p497_p12)
}
  0xd4   :  { %s501_s26 = scalar_lea.hbm %s778_s1, 2048 }
  0xd5   :  { %p502_p13 = scmp.ne.s32.totalorder %s778_s1, %s501_s26  ;;  %p505_p0 = scmp.lt.u32.totalorder %s501_s26, %s778_s1 }
  0xd7   :  { %p507_p1 = pnand %p505_p0, %p502_p13 }
  0xd9   :  { %510 = shalt.err (!%p507_p1)
}
  0xda   :  { %455 = dma.vmem_to_hbm [thread:$0]  %s450_s22, 2048, %s778_s1, [#allocation4], %s516_s16, %s516_s16, %s517_s17  }
  0xdb   :  { %513 = dma.done.wait [#allocation4], 2048  }
  0xdc   :  { %514 = vsyncadd [#allocation4], 4294965248 }
  0xdd   :  { %459 = vsyncpa [#allocation3], 1 }
  0xde   :  { %460 = vsyncpa [#allocation4], 1 }

</bundles_post_ra>
